<compile_context>
chip_gen: v5e
topology: v5e:2x2
jax: 0.10.0
libtpu: 0.0.40
codegen_flags: <defaults>
</compile_context>

<pallas_src>
import functools

import jax
import jax.numpy as jnp
from jax.experimental import pallas as pl
from jax.experimental.pallas import tpu as pltpu


def _angle_expansion_kernel(coeff_ref, angle_ref, out_ref, *, compute_dtype):
    # coeff_ref: (2H, 1)    -- resident across grid steps (constant index_map)
    # angle_ref: (1, TILE_N) lane-dense row
    # out_ref:   (2H, TILE_N) lane-dense output tile
    prod = coeff_ref[...] * angle_ref[...]           # (2H, TILE_N) f32, 128-lane VPU
    if compute_dtype != jnp.dtype(jnp.float32):
        # v6e/v7x only: packed-bf16 VALU ~doubles throughput of the software
        # cos (the binding slot).  Do NOT use on v5e (no bf16 VALU).
        prod = prod.astype(compute_dtype)
    out_ref[...] = jnp.cos(prod).astype(out_ref.dtype)


def _round_up(x, m):
    return ((x + m - 1) // m) * m


def _num_tensorcores():
    """2 TensorCores per chip on v7x, 1 on v5e/v6e. Safe fallback: 1."""
    try:
        kind = jax.devices()[0].device_kind.lower()
    except Exception:  # no devices / unusual backend
        return 1
    return 2 if "v7" in kind else 1


def _pick_tile(n, tile_n, num_tensorcores):
    # Lane-dense tiles are multiples of 128 along N; never larger than needed.
    tile = max(128, min(int(tile_n), _round_up(n, 128)))
    # v7x only: if one tile would swallow all the work but there is enough of
    # it, split into exactly 2 grid steps (even grid) so the "parallel" axis
    # shards one step onto each TensorCore.  On 1-TC chips this would only add
    # a useless ~0.35 us grid step, so skip it there.
    if num_tensorcores >= 2 and tile >= n and n >= 256:
        tile = max(128, _round_up(-(-n // 2), 128))
    return tile


@functools.partial(
    jax.jit,
    static_argnames=("tile_n", "out_dtype", "compute_dtype",
                     "transposed_output", "num_tensorcores"),
)
def angle_expansion(angle, coeff, *, tile_n=16384, out_dtype=jnp.float32,
                    compute_dtype=jnp.float32, transposed_output=False,
                    num_tensorcores=None):
    """angle: any shape (floating). coeff: (2H,).

    Returns (angle.size, 2H) by default (PyTorch-compatible; costs one XLA
    transpose pass over the output), or the lane-dense (2H, angle.size) slab
    with no extra HBM pass if transposed_output=True (preferred when the
    consumer can accept it).
    """
    if num_tensorcores is None:
        num_tensorcores = _num_tensorcores()
    compute_dtype = jnp.dtype(compute_dtype)

    n = angle.size
    two_h = coeff.shape[0]

    angle_row = angle.reshape(1, n).astype(jnp.float32)       # (1, N) lane-dense
    coeff_col = coeff.astype(jnp.float32).reshape(two_h, 1)   # (2H, 1) resident

    tile = _pick_tile(n, tile_n, num_tensorcores)
    grid = (pl.cdiv(n, tile),)   # no padding: Pallas masks the boundary block

    kernel = functools.partial(_angle_expansion_kernel,
                               compute_dtype=compute_dtype)

    out_t = pl.pallas_call(
        kernel,
        out_shape=jax.ShapeDtypeStruct((two_h, n), out_dtype),
        grid_spec=pltpu.PrefetchScalarGridSpec(
            num_scalar_prefetch=0,
            grid=grid,
            in_specs=[
                # coeff: constant index_map -> fetched once, stays in VMEM.
                pl.BlockSpec((two_h, 1), lambda i: (0, 0)),
                # angle: (1, tile) lane-dense row blocks along N.
                pl.BlockSpec((1, tile), lambda i: (0, i)),
            ],
            out_specs=pl.BlockSpec((two_h, tile), lambda i: (0, i)),
        ),
        compiler_params=pltpu.CompilerParams(
            dimension_semantics=("parallel",)
        ),
    )(coeff_col, angle_row)

    if transposed_output:
        return out_t          # (2H, N): no extra HBM pass (preferred layout)
    # PyTorch-exact (N, 2H).  This is one extra XLA transpose pass over the
    # output (~2x the kernel's own HBM traffic for large N); use
    # transposed_output=True to avoid it when the consumer can.
    return out_t.T


def make_coeff(start=1.0, stop=5.0, half_expansion=10):
    """Deterministic buffer init, matching the PyTorch __init__ exactly."""
    l_mul = 1.0 / jnp.linspace(stop, start, half_expansion, dtype=jnp.float32)
    r_mul = jnp.linspace(start, stop, half_expansion, dtype=jnp.float32)
    return jnp.concatenate([l_mul, r_mul], axis=-1)  # (2 * half_expansion,)


if __name__ == "__main__":
    key = jax.random.PRNGKey(0)
    # Small angle tensor (any shape works; forward flattens it). N = 2*4*16 = 128.
    angle = jax.random.uniform(
        key, (2, 4, 16), dtype=jnp.float32, minval=-3.14, maxval=3.14
    )
    coeff = make_coeff(start=1.0, stop=5.0, half_expansion=10)  # (20,)

    # Reference in plain JAX (same math as the PyTorch forward).
    ref = jnp.cos(angle.reshape(-1, 1) * coeff.reshape(1, -1))

    # Default path: PyTorch-compatible (N, 2H) output, f32 compute.
    out = angle_expansion(angle, coeff)
    jax.block_until_ready(out)
    assert out.shape == (angle.size, coeff.shape[0])
    assert jnp.allclose(out, ref, atol=1e-5, rtol=1e-5)

    # Lane-dense fast path: (2H, N), skips the final transpose entirely.
    out_t = angle_expansion(angle, coeff, transposed_output=True)
    jax.block_until_ready(out_t)
    assert out_t.shape == (coeff.shape[0], angle.size)
    assert jnp.allclose(out_t, ref.T, atol=1e-5, rtol=1e-5)

    print("KERNEL_OK")
</pallas_src>

<mosaic_0001>
module attributes {stable_mosaic.version = 11 : i64} {
  func.func @_angle_expansion_kernel(%arg0: i32, %arg1: memref<20x1xf32, #tpu.memory_space<vmem>>, %arg2: memref<1x128xf32, #tpu.memory_space<vmem>>, %arg3: memref<20x128xf32, #tpu.memory_space<vmem>>) attributes {dimension_semantics = [#tpu.dimension_semantics<parallel>], iteration_bounds = array<i64: 1>, scalar_prefetch = 0 : i64, scratch_operands = 0 : i64, tpu.core_type = #tpu.core_type<tc>, window_params = [{pipeline_mode = #tpu.pipeline_mode<synchronous>, transform_indices = @transform_0, window_bounds = array<i64: 20, 1>}, {transform_indices = @transform_1, window_bounds = array<i64: 1, 128>}, {transform_indices = @transform_2, window_bounds = array<i64: 20, 128>}]} {
    %c0 = arith.constant 0 : index
    %c0_0 = arith.constant 0 : index
    %0 = vector.load %arg1[%c0, %c0_0] : memref<20x1xf32, #tpu.memory_space<vmem>>, vector<20x1xf32>
    %c0_1 = arith.constant 0 : index
    %c0_2 = arith.constant 0 : index
    %1 = vector.load %arg2[%c0_1, %c0_2] : memref<1x128xf32, #tpu.memory_space<vmem>>, vector<1x128xf32>
    %2 = vector.broadcast %0 : vector<20x1xf32> to vector<20x128xf32>
    %3 = vector.broadcast %1 : vector<1x128xf32> to vector<20x128xf32>
    %4 = arith.mulf %2, %3 : vector<20x128xf32>
    %5 = math.cos %4 : vector<20x128xf32>
    %c0_3 = arith.constant 0 : index
    %c0_4 = arith.constant 0 : index
    %6 = vector.load %arg3[%c0_3, %c0_4] : memref<20x128xf32, #tpu.memory_space<vmem>>, vector<20x128xf32>
    tpu.vector_store %arg3[%c0_3, %c0_4], %5 {strides = array<i32>} : memref<20x128xf32, #tpu.memory_space<vmem>>, vector<20x128xf32>,
    return
  }
  func.func @transform_0(%arg0: i32) -> (i32, i32) {
    %c0_i32 = arith.constant 0 : i32
    %c0_i32_0 = arith.constant 0 : i32
    %c0_i32_1 = arith.constant 0 : i32
    return %c0_i32, %c0_i32_0 : i32, i32
  }
  func.func @transform_1(%arg0: i32) -> (i32, i32) {
    %c0_i32 = arith.constant 0 : i32
    %c0_i32_0 = arith.constant 0 : i32
    return %c0_i32, %arg0 : i32, i32
  }
  func.func @transform_2(%arg0: i32) -> (i32, i32) {
    %c0_i32 = arith.constant 0 : i32
    %c0_i32_0 = arith.constant 0 : i32
    return %c0_i32, %arg0 : i32, i32
  }
}

</mosaic_0001>

<bundles_post_ra>
// kernel: angle_expansion.1
= control target key start
LH: loop header
LB: loop body
LE: loop exit
PB: predicated region body
PF: predicated region fallthrough
CT: control target
= control target key end

     0   :  { %v568_v2 = vmov 0   ;;  %s902_s0 = inlined_call_operand.vmem [shape: f32[20,1], index: 0, kind: input, shape index: {}]   ;;  %s903_s1 = inlined_call_operand.vmem [shape: f32[1,128], index: 1, kind: input, shape index: {}]   ;;  %s904_s2 = inlined_call_operand.hbm [shape: f32[20,128], index: 2, kind: output, shape index: {}]  }
   0x1   :  { %v14_v0 = vld [vmem:[%s902_s0 + $0x10] sm:$0xf]  ;;  %v12_v1 = vld [vmem:[%s902_s0] sm:$0xff]  ;;  %540 = vset.pattern.permute.xlu1 %v568_v2  ;;  %539 = vset.pattern.permute.xlu0 %v568_v2 }
   0x2   :  { %28 = vperm.xlu1 %540, %v14_v0   ;;  %18 = vperm.xlu0 %539, %v12_v1  }
   0x3   :  { %7 = vsyncpa [#allocation3], 0  ;;  %v13_v3 = vld [vmem:[%s902_s0 + $0x8] sm:$0xff]  ;;  %v541_v4 = vld [vmem:[%s903_s1] ss:$0 sm:$0xff]  ;;  %s575_s0 = smov [#allocation2]  }
   0x4   :  { %v569_v31 = vmov 683565275   ;;  %v570_v33 = vmov 2475754826   ;;  %v571_v35 = vmov 2131351028  }
   0x5   :  { %v572_v37 = vmov 2102212464   ;;  %v573_v39 = vmov 920167782   ;;  %v574_v48 = vmov 1326507024  }
   0x6   :  { %s506_s1 = sshll.u32 %s575_s0, 4  ;;  %s508_s19 = sshll.u32 %s904_s2, 4  ;;  %s507_s1 = int_to_ptr.vmem [resolvable:$true] %s506_s1  ;;  %s509_s19 = int_to_ptr.hbm [resolvable:$true] %s508_s19 }
   0x7   :  { %s576_s20 = smov 128   ;;  %s577_s21 = smov 8  }
   0xa   :  { %23 = vperm.xlu0 %539, %v13_v3  }
  0x74   :  { %v29_v5 = vpop.permute.xlu1 %28  ;;  %v19_v6 = vpop.permute.xlu0 %18 }
  0x75   :  { %v607_v7 = vmul.f32 %v541_v4, %v29_v5  ;;  %v609_v8 = vmul.f32 %v541_v4, %v19_v6 }
  0x77   :  { %v345_v9 = vand.u32 2147483647, %v607_v7  ;;  %v348_v10 = vand.u32 2139095040, %v607_v7  ;;  %v37_v11 = vand.u32 2147483647, %v609_v8  ;;  %v40_v12 = vand.u32 2139095040, %v609_v8 }
  0x79   :  { %v349_v13 = vshrl.u32 %v348_v10, 23  ;;  %v352_v14 = vand.u32 8388607, %v345_v9  ;;  %v41_v15 = vshrl.u32 %v40_v12, 23  ;;  %v44_v18 = vand.u32 8388607, %v37_v11 }
  0x7b   :  { %v526_v16 = vadd.s32 4294967169, %v349_v13  ;;  %v520_v17 = vadd.s32 4294967169, %v41_v15  ;;  %v353_v19 = vor.u32 8388608, %v352_v14  ;;  %v45_v23 = vor.u32 8388608, %v44_v18 }
  0x7c   :  { %v24_v27 = vpop.permute.xlu0 %23 }
  0x7d   :  { %v355_v20 = vadd.s32 1, %v526_v16  ;;  %v47_v21 = vadd.s32 1, %v520_v17  ;;  %v619_v25 = vshll.u32 %v353_v19, 8  ;;  %v630_v41 = vshll.u32 %v45_v23, 8 }
  0x7e   :  { %v632_v42 = vmul.f32 %v541_v4, %v24_v27 }
  0x7f   :  { %vm356_vm0 = vcmp.gt.s32.totalorder %v355_v20, 0  ;;  %vm48_vm1 = vcmp.gt.s32.totalorder %v47_v21, 0  ;;  %v394_v46 = vand.u32 65535, %v619_v25  ;;  %v395_v56 = vshrl.u32 %v619_v25, 16 }
  0x80   :  { %v357_v22 = vsel %vm356_vm0, %v355_v20, 0  ;;  %v49_v26 = vsel %vm48_vm1, %v47_v21, 0  ;;  %v653_v59 = vand.u32 65535, %v630_v41 }
  0x81   :  { %v359_v24 = vand.u32 31, %v357_v22  ;;  %v621_v28 = vshrl.u32 %v357_v22, 5  ;;  %v623_v29 = vand.u32 31, %v49_v26  ;;  %v682_v19 = vshrl.u32 %v49_v26, 5 }
  0x83   :  { %v360_v30 = vsub.s32 32, %v359_v24  ;;  %v362_v32 = vshll.u32 %v569_v31, %v359_v24  ;;  %v365_v34 = vshll.u32 %v570_v33, %v359_v24  ;;  %v368_v36 = vshll.u32 %v571_v35, %v359_v24 }
  0x84   :  { %v371_v38 = vshll.u32 %v572_v37, %v359_v24  ;;  %v374_v40 = vshll.u32 %v573_v39, %v359_v24  ;;  %vm377_vm2 = vcmp.lt.s32.totalorder %v621_v28, 1  ;;  %vm380_vm3 = vcmp.lt.s32.totalorder %v621_v28, 4 }
  0x85   :  { %v363_v43 = vshrl.u32 %v570_v33, %v360_v30  ;;  %v366_v44 = vshrl.u32 %v571_v35, %v360_v30  ;;  %v369_v45 = vshrl.u32 %v572_v37, %v360_v30  ;;  %v372_v47 = vshrl.u32 %v573_v39, %v360_v30 }
  0x86   :  { %v375_v49 = vshrl.u32 %v574_v48, %v360_v30  ;;  %v643_v53 = vsub.s32 32, %v623_v29  ;;  %vm379_vm4 = vcmp.lt.s32.totalorder %v621_v28, 3  ;;  %vm378_vm5 = vcmp.lt.s32.totalorder %v621_v28, 2 }
  0x87   :  { %v364_v50 = vor.u32 %v363_v43, %v362_v32  ;;  %v367_v51 = vor.u32 %v366_v44, %v365_v34  ;;  %v370_v52 = vor.u32 %v369_v45, %v368_v36  ;;  %v373_v54 = vor.u32 %v372_v47, %v371_v38 }
  0x88   :  { %v376_v55 = vor.u32 %v375_v49, %v374_v40  ;;  %v361_v60 = vshrl.u32 %v569_v31, %v360_v30  ;;  %v54_v63 = vshll.u32 %v569_v31, %v623_v29  ;;  %v55_v4 = vshrl.u32 %v570_v33, %v643_v53 }
  0x89   :  { %v385_v57 = vsel %vm377_vm2, %v364_v50, %v367_v51  ;;  %v389_v58 = vsel %vm377_vm2, %v367_v51, %v370_v52  ;;  %v386_v61 = vsel %vm380_vm3, %v373_v54, 920167782  ;;  %v382_v0 = vsel %vm380_vm3, %v370_v52, 2102212464 }
  0x8a   :  { %v390_v62 = vsel %vm380_vm3, %v376_v55, 1326507024  ;;  %v387_v1 = vsel %vm379_vm4, %v370_v52, %v386_v61  ;;  %v57_v10 = vshll.u32 %v570_v33, %v623_v29  ;;  %v58_v12 = vshrl.u32 %v571_v35, %v643_v53 }
  0x8b   :  { %v391_v3 = vsel %vm379_vm4, %v373_v54, %v390_v62  ;;  %v388_v5 = vsel %vm378_vm5, %v385_v57, %v387_v1  ;;  %v381_v17 = vsel %vm377_vm2, %v361_v60, %v364_v50  ;;  %v383_v18 = vsel %vm379_vm4, %v367_v51, %v382_v0 }
  0x8c   :  { %v392_v6 = vsel %vm378_vm5, %v389_v58, %v391_v3  ;;  %v418_v15 = vand.u32 65535, %v388_v5  ;;  %v419_v16 = vshrl.u32 %v388_v5, 16  ;;  %v684_v20 = vor.u32 %v55_v4, %v54_v63 }
  0x8d   :  { %v396_v13 = vand.u32 65535, %v392_v6  ;;  %v397_v14 = vshrl.u32 %v392_v6, 16  ;;  %v686_v23 = vor.u32 %v58_v12, %v57_v10  ;;  %v61_v24 = vshrl.u32 %v572_v37, %v643_v53 }
  0x8e   :  { %v421_v30 = vmul.u32 %v419_v16, %v394_v46  ;;  %v422_v32 = vmul.u32 %v418_v15, %v395_v56  ;;  %v60_v34 = vshll.u32 %v571_v35, %v623_v29  ;;  %v420_v40 = vmul.u32 %v418_v15, %v394_v46 }
  0x8f   :  { %v399_v21 = vmul.u32 %v397_v14, %v394_v46  ;;  %v400_v22 = vmul.u32 %v396_v13, %v395_v56  ;;  %v398_v27 = vmul.u32 %v396_v13, %v394_v46  ;;  %v401_v36 = vmul.u32 %v397_v14, %v395_v56 }
  0x90   :  { %v423_v26 = vmul.u32 %v419_v16, %v395_v56  ;;  %v424_v47 = vshll.u32 %v421_v30, 16  ;;  %v426_v50 = vshll.u32 %v422_v32, 16  ;;  %v62_v51 = vor.u32 %v61_v24, %v60_v34 }
  0x91   :  { %v402_v38 = vshll.u32 %v399_v21, 16  ;;  %v403_v43 = vshrl.u32 %v399_v21, 16  ;;  %v404_v44 = vshll.u32 %v400_v22, 16  ;;  %v405_v45 = vshrl.u32 %v400_v22, 16 }
  0x92   :  { %vm428_vm7 = vc.u32 %v420_v40, %v424_v47  ;;  %v430_v54 = vadd.s32 %v424_v47, %v420_v40  ;;  %v64_v55 = vshrl.u32 %v573_v39, %v643_v53  ;;  %v63_v56 = vshll.u32 %v572_v37, %v623_v29 }
  0x93   :  { %vm406_vm6 = vc.u32 %v398_v27, %v402_v38  ;;  %v408_v49 = vadd.s32 %v402_v38, %v398_v27  ;;  %v429_v46 = vsel %vm428_vm7, 1, %v568_v2  ;;  %v66_v61 = vshll.u32 %v573_v39, %v623_v29 }
  0x94   :  { %v407_v52 = vsel %vm406_vm6, 1, %v568_v2  ;;  %v431_v60 = vadd.s32 %v429_v46, %v423_v26  ;;  %vm432_vm9 = vc.u32 %v430_v54, %v426_v50  ;;  %v65_v0 = vor.u32 %v64_v55, %v63_v56 }
  0x95   :  { %v409_v57 = vadd.s32 %v407_v52, %v401_v36  ;;  %vm410_vm8 = vc.u32 %v408_v49, %v404_v44  ;;  %v433_v63 = vsel %vm432_vm9, 1, %v568_v2  ;;  %v67_v1 = vshrl.u32 %v574_v48, %v643_v53 }
  0x96   :  { %v411_v58 = vsel %vm410_vm8, 1, %v568_v2  ;;  %v425_v3 = vshrl.u32 %v421_v30, 16  ;;  %v427_v4 = vshrl.u32 %v422_v32, 16  ;;  %v704_v5 = vadd.s32 %v430_v54, %v426_v50 }
  0x97   :  { %v413_v62 = vadd.s32 %v411_v58, %v409_v57  ;;  %v435_v6 = vadd.s32 %v433_v63, %v431_v60  ;;  %v68_v12 = vor.u32 %v67_v1, %v66_v61  ;;  %vm69_vm10 = vcmp.lt.s32.totalorder %v682_v19, 1 }
  0x98   :  { %vm72_vm11 = vcmp.lt.s32.totalorder %v682_v19, 4  ;;  %vm71_vm12 = vcmp.lt.s32.totalorder %v682_v19, 3  ;;  %v77_v29 = vsel %vm69_vm10, %v684_v20, %v686_v23  ;;  %vm70_vm13 = vcmp.lt.s32.totalorder %v682_v19, 2 }
  0x99   :  { %v414_v10 = vadd.s32 %v413_v62, %v403_v43  ;;  %v436_v13 = vadd.s32 %v435_v6, %v425_v3  ;;  %v78_v14 = vsel %vm72_vm11, %v65_v0, 920167782  ;;  %v81_v21 = vsel %vm69_vm10, %v686_v23, %v62_v51 }
  0x9a   :  { %v79_v16 = vsel %vm71_vm12, %v62_v51, %v78_v14  ;;  %v384_v22 = vsel %vm378_vm5, %v381_v17, %v383_v18  ;;  %v82_v30 = vsel %vm72_vm11, %v68_v12, 1326507024  ;;  %v87_v34 = vshrl.u32 %v630_v41, 16 }
  0x9b   :  { %v715_v15 = vadd.s32 %v414_v10, %v405_v45  ;;  %v437_v24 = vadd.s32 %v436_v13, %v427_v4  ;;  %v80_v27 = vsel %vm70_vm13, %v77_v29, %v79_v16  ;;  %v83_v32 = vsel %vm71_vm12, %v65_v0, %v82_v30 }
  0x9c   :  { %v110_v36 = vand.u32 65535, %v80_v27  ;;  %v84_v28 = vsel %vm70_vm13, %v81_v21, %v83_v32  ;;  %v111_v17 = vshrl.u32 %v80_v27, 16  ;;  %v194_v18 = vand.u32 2139095040, %v632_v42 }
  0x9d   :  { %vm440_vm14 = vc.u32 %v715_v15, %v704_v5  ;;  %v441_v38 = vadd.s32 1, %v437_v24  ;;  %v438_v40 = vmul.u32 %v619_v25, %v384_v22  ;;  %v88_v26 = vand.u32 65535, %v84_v28 }
  0x9e   :  { %v89_v43 = vshrl.u32 %v84_v28, 16  ;;  %v53_v45 = vshrl.u32 %v569_v31, %v643_v53  ;;  %v113_v47 = vmul.u32 %v111_v17, %v653_v59  ;;  %v114_v49 = vmul.u32 %v110_v36, %v87_v34 }
  0x9f   :  { %v442_v44 = vsel %vm440_vm14, %v441_v38, %v437_v24  ;;  %v74_v52 = vsel %vm72_vm11, %v62_v51, 2102212464  ;;  %v92_v55 = vmul.u32 %v88_v26, %v87_v34  ;;  %v112_v57 = vmul.u32 %v110_v36, %v653_v59 }
  0xa0   :  { %v443_v50 = vadd.s32 %v442_v44, %v438_v40  ;;  %v91_v54 = vmul.u32 %v89_v43, %v653_v59  ;;  %v115_v46 = vmul.u32 %v111_v17, %v87_v34  ;;  %v116_v25 = vshll.u32 %v113_v47, 16 }
  0xa1   :  { %v195_v56 = vshrl.u32 %v194_v18, 23  ;;  %v90_v60 = vmul.u32 %v88_v26, %v653_v59  ;;  %v93_v61 = vmul.u32 %v89_v43, %v87_v34  ;;  %v96_v62 = vshll.u32 %v92_v55, 16 }
  0xa2   :  { %v444_v58 = vadd.s32 536870912, %v443_v50  ;;  %v94_v53 = vshll.u32 %v91_v54, 16  ;;  %v118_v63 = vshll.u32 %v114_v49, 16  ;;  %vm120_vm15 = vc.u32 %v112_v57, %v116_v25 }
  0xa3   :  { %v122_v0 = vadd.s32 %v116_v25, %v112_v57  ;;  %v121_v3 = vsel %vm120_vm15, 1, %v568_v2  ;;  %v191_v10 = vand.u32 2147483647, %v632_v42  ;;  %v73_v59 = vsel %vm69_vm10, %v53_v45, %v684_v20 }
  0xa4   :  { %v445_v1 = vshrl.u32 %v444_v58, 30  ;;  %vm98_vm0 = vc.u32 %v90_v60, %v94_v53  ;;  %v100_v51 = vadd.s32 %v94_v53, %v90_v60  ;;  %v123_v6 = vadd.s32 %v121_v3, %v115_v46 }
  0xa5   :  { %v99_v4 = vsel %vm98_vm0, 1, %v568_v2  ;;  %vm124_vm1 = vc.u32 %v122_v0, %v118_v63  ;;  %v75_v29 = vsel %vm71_vm12, %v686_v23, %v74_v52  ;;  %v523_v21 = vadd.s32 4294967169, %v195_v56 }
  0xa6   :  { %v446_v12 = vshll.u32 %v445_v1, 30  ;;  %v101_v13 = vadd.s32 %v99_v4, %v93_v61  ;;  %vm102_vm2 = vc.u32 %v100_v51, %v96_v62  ;;  %v125_v16 = vsel %vm124_vm1, 1, %v568_v2 }
  0xa7   :  { %v103_v14 = vsel %vm102_vm2, 1, %v568_v2  ;;  %v95_v24 = vshrl.u32 %v91_v54, 16  ;;  %v127_v30 = vadd.s32 %v125_v16, %v123_v6  ;;  %v117_v32 = vshrl.u32 %v113_v47, 16 }
  0xa8   :  { %v447_v22 = vsub.s32 %v443_v50, %v446_v12  ;;  %v105_v27 = vadd.s32 %v103_v14, %v101_v13  ;;  %v201_v34 = vadd.s32 1, %v523_v21  ;;  %v76_v20 = vsel %vm70_vm13, %v73_v59, %v75_v29 }
  0xa9   :  { %v97_v28 = vshrl.u32 %v92_v55, 16  ;;  %v119_v17 = vshrl.u32 %v114_v49, 16  ;;  %v128_v23 = vadd.s32 %v127_v30, %v117_v32  ;;  %v469_v40 = vsub.s32 4, %v445_v1 }
  0xaa   :  { %vm448_vm3 = vcmp.lt.s32.totalorder %v447_v22, 0  ;;  %v449_v36 = vsub.s32 0, %v447_v22  ;;  %v106_v38 = vadd.s32 %v105_v27, %v95_v24  ;;  %vm202_vm4 = vcmp.gt.s32.totalorder %v201_v34, 0 }
  0xab   :  { %v759_v26 = vadd.s32 %v122_v0, %v118_v63  ;;  %v198_v43 = vand.u32 8388607, %v191_v10  ;;  %v129_v47 = vadd.s32 %v128_v23, %v119_v17  ;;  %v203_v50 = vsel %vm202_vm4, %v201_v34, 0 }
  0xac   :  { %v450_v18 = vsel %vm448_vm3, %v449_v36, %v447_v22  ;;  %v763_v45 = vadd.s32 %v106_v38, %v97_v28  ;;  %v205_v52 = vand.u32 31, %v203_v50  ;;  %vm347_vm5 = vcmp.lt.s32.totalorder %v607_v7, 0 }
  0xad   :  { %v451_v44 = vclz %v450_v18  ;;  %v133_v49 = vadd.s32 1, %v129_v47  ;;  %v439_v54 = vadd.s32 %v704_v5, %v715_v15  ;;  %v470_v55 = vsel %vm347_vm5, %v469_v40, %v445_v1 }
  0xae   :  { %vm132_vm6 = vc.u32 %v763_v45, %v759_v26  ;;  %v130_v57 = vmul.u32 %v630_v41, %v76_v20  ;;  %v206_v46 = vsub.s32 32, %v205_v52  ;;  %v199_v56 = vor.u32 8388608, %v198_v43 }
  0xaf   :  { %v527_v19 = vadd.s32 4294967294, %v451_v44  ;;  %v134_v25 = vsel %vm132_vm6, %v133_v49, %v129_v47  ;;  %v773_v58 = vshrl.u32 %v203_v50, 5  ;;  %v208_v53 = vshll.u32 %v569_v31, %v205_v52 }
  0xb0   :  { %v135_v61 = vadd.s32 %v134_v25, %v130_v57  ;;  %v209_v62 = vshrl.u32 %v570_v33, %v206_v46  ;;  %v211_v5 = vshll.u32 %v570_v33, %v205_v52  ;;  %v212_v15 = vshrl.u32 %v571_v35, %v206_v46 }
  0xb1   :  { %vm528_vm7 = vcmp.lt.s32.totalorder %v527_v19, 0  ;;  %v215_v41 = vshrl.u32 %v572_v37, %v206_v46  ;;  %v217_v51 = vshll.u32 %v572_v37, %v205_v52  ;;  %v218_v3 = vshrl.u32 %v573_v39, %v206_v46 }
  0xb2   :  { %v454_v60 = vsel %vm528_vm7, 0, %v527_v19  ;;  %v136_v1 = vadd.s32 536870912, %v135_v61  ;;  %v221_v59 = vshrl.u32 %v574_v48, %v206_v46  ;;  %v210_v29 = vor.u32 %v209_v62, %v208_v53 }
  0xb3   :  { %v455_v63 = vsub.s32 32, %v454_v60  ;;  %v459_v0 = vsub.s32 4294967266, %v454_v60  ;;  %v456_v4 = vshll.u32 %v447_v22, %v454_v60  ;;  %v785_v14 = vor.u32 %v212_v15, %v211_v5 }
  0xb4   :  { %v783_v13 = vshrl.u32 %v136_v1, 30  ;;  %v214_v33 = vshll.u32 %v571_v35, %v205_v52  ;;  %v219_v24 = vor.u32 %v218_v3, %v217_v51  ;;  %v220_v27 = vshll.u32 %v573_v39, %v205_v52 }
  0xb5   :  { %v457_v6 = vshrl.u32 %v439_v54, %v455_v63  ;;  %v460_v12 = vadd.s32 127, %v459_v0  ;;  %vm791_vm8 = vcmp.le.f32.partialorder %v345_v9, 0.7853982  ;;  %vm223_vm9 = vcmp.lt.s32.totalorder %v773_v58, 1 }
  0xb6   :  { %v138_v48 = vshll.u32 %v783_v13, 30  ;;  %v216_v22 = vor.u32 %v215_v41, %v214_v33  ;;  %v472_v32 = vsel %vm791_vm8, 0, %v470_v55  ;;  %v222_v34 = vor.u32 %v221_v59, %v220_v27 }
  0xb7   :  { %v458_v16 = vor.u32 %v457_v6, %v456_v4  ;;  %v461_v21 = vshll.u32 %v460_v12, 23  ;;  %vm226_vm10 = vcmp.lt.s32.totalorder %v773_v58, 4  ;;  %v231_v9 = vsel %vm223_vm9, %v210_v29, %v785_v14 }
  0xb8   :  { %v799_v35 = vsub.s32 %v135_v61, %v138_v48  ;;  %v805_v39 = vshll.u32 %v199_v56, 8  ;;  %vm225_vm11 = vcmp.lt.s32.totalorder %v773_v58, 3  ;;  %v232_v38 = vsel %vm226_vm10, %v219_v24, 920167782 }
  0xb9   :  { %v462_v30 = vor.u32 4788187, %v461_v21  ;;  %v465_v20 = vcvt.s32.f32 %v458_v16  ;;  %vm224_vm13 = vcmp.lt.s32.totalorder %v773_v58, 2  ;;  %v233_v17 = vsel %vm225_vm11, %v216_v22, %v232_v38 }
  0xba   :  { %vm140_vm12 = vcmp.lt.s32.totalorder %v799_v35, 0  ;;  %v141_v28 = vsub.s32 0, %v799_v35  ;;  %v234_v18 = vsel %vm224_vm13, %v231_v9, %v233_v17  ;;  %v235_v40 = vsel %vm223_vm9, %v785_v14, %v216_v22 }
  0xbb   :  { %v463_v36 = vand.u32 2147483647, %v462_v30  ;;  %v236_v43 = vsel %vm226_vm10, %v222_v34, 1326507024  ;;  %v822_v44 = vand.u32 3, %v472_v32  ;;  %v240_v49 = vand.u32 65535, %v805_v39 }
  0xbc   :  { %v142_v47 = vsel %vm140_vm12, %v141_v28, %v799_v35  ;;  %v237_v19 = vsel %vm225_vm11, %v219_v24, %v236_v43  ;;  %v207_v54 = vshrl.u32 %v569_v31, %v206_v46  ;;  %v264_v57 = vand.u32 65535, %v234_v18 }
  0xbd   :  { %v466_v23 = vmul.f32 %v465_v20, %v463_v36  ;;  %v143_v52 = vclz %v142_v47  ;;  %v238_v55 = vsel %vm224_vm13, %v235_v40, %v237_v19  ;;  %v265_v25 = vshrl.u32 %v234_v18, 16 }
  0xbe   :  { %v242_v61 = vand.u32 65535, %v238_v55  ;;  %v243_v53 = vshrl.u32 %v238_v55, 16  ;;  %v131_v63 = vadd.s32 %v759_v26, %v763_v45  ;;  %v840_v31 = vsel %vm223_vm9, %v207_v54, %v210_v29 }
  0xbf   :  { %v467_v50 = vxor.u32 2147483648, %v466_v23  ;;  %v521_v60 = vadd.s32 4294967294, %v143_v52  ;;  %v241_v46 = vshrl.u32 %v805_v39, 16  ;;  %v228_v5 = vsel %vm226_vm10, %v216_v22, 2102212464 }
  0xc0   :  { %v245_v15 = vmul.u32 %v243_v53, %v240_v49  ;;  %v266_v51 = vmul.u32 %v264_v57, %v240_v49  ;;  %v267_v3 = vmul.u32 %v265_v25, %v240_v49  ;;  %v244_v59 = vmul.u32 %v242_v61, %v240_v49 }
  0xc1   :  { %v468_v56 = vsel %vm347_vm5, %v467_v50, %v466_v23  ;;  %vm522_vm14 = vcmp.lt.s32.totalorder %v521_v60, 0  ;;  %v246_v41 = vmul.u32 %v242_v61, %v241_v46  ;;  %v845_v26 = vmul.u32 %v264_v57, %v241_v46 }
  0xc2   :  { %v471_v62 = vsel %vm791_vm8, %v607_v7, %v468_v56  ;;  %v146_v1 = vsel %vm522_vm14, 0, %v521_v60  ;;  %v247_v29 = vmul.u32 %v243_v53, %v241_v46  ;;  %v248_v33 = vshll.u32 %v245_v15, 16 }
  0xc3   :  { %v473_v0 = vmul.f32 %v471_v62, %v471_v62  ;;  %v147_v12 = vsub.s32 32, %v146_v1  ;;  %v151_v45 = vsub.s32 4294967266, %v146_v1  ;;  %v148_v24 = vshll.u32 %v799_v35, %v146_v1 }
  0xc4   :  { %v250_v48 = vshll.u32 %v246_v41, 16  ;;  %vm252_vm15 = vc.u32 %v244_v59, %v248_v33  ;;  %v254_v22 = vadd.s32 %v248_v33, %v244_v59  ;;  %v270_v9 = vshll.u32 %v267_v3, 16 }
  0xc5   :  { %v474_v4 = vmul.f32 -0.001358992, %v473_v0  ;;  %v481_v6 = vmul.f32 -0.00019511016, %v473_v0  ;;  %v149_v27 = vshrl.u32 %v131_v63, %v147_v12  ;;  %v152_v37 = vadd.s32 127, %v151_v45 }
  0xc6   :  { %v253_v34 = vsel %vm252_vm15, 1, %v568_v2  ;;  %vm256_vm0 = vc.u32 %v254_v22, %v250_v48  ;;  %vm39_vm1 = vcmp.lt.s32.totalorder %v609_v8, 0  ;;  %v269_v23 = vmul.u32 %v265_v25, %v241_v46 }
  0xc7   :  { %v475_v16 = vadd.f32 0.041655596, %v474_v4  ;;  %v482_v21 = vadd.f32 0.008332121, %v481_v6  ;;  %v150_v36 = vor.u32 %v149_v27, %v148_v24  ;;  %v153_v20 = vshll.u32 %v152_v37, 23 }
  0xc8   :  { %v255_v38 = vadd.s32 %v253_v34, %v247_v29  ;;  %v257_v35 = vsel %vm256_vm0, 1, %v568_v2  ;;  %v249_v40 = vshrl.u32 %v245_v15, 16  ;;  %v272_v47 = vshll.u32 %v845_v26, 16 }
  0xc9   :  { %v476_v30 = vmul.f32 %v475_v16, %v473_v0  ;;  %v483_v32 = vmul.f32 %v482_v21, %v473_v0  ;;  %v154_v18 = vor.u32 4788187, %v153_v20  ;;  %vm274_vm2 = vc.u32 %v266_v51, %v270_v9 }
  0xca   :  { %v259_v43 = vadd.s32 %v257_v35, %v255_v38  ;;  %v276_v19 = vadd.s32 %v270_v9, %v266_v51  ;;  %v157_v54 = vcvt.s32.f32 %v150_v36  ;;  %v275_v57 = vsel %vm274_vm2, 1, %v568_v2 }
  0xcb   :  { %v477_v28 = vadd.f32 -0.4999988, %v476_v30  ;;  %v484_v17 = vadd.f32 -0.16666654, %v483_v32  ;;  %v155_v49 = vand.u32 2147483647, %v154_v18  ;;  %v277_v61 = vadd.s32 %v275_v57, %v269_v23 }
  0xcc   :  { %v260_v55 = vadd.s32 %v259_v43, %v249_v40  ;;  %vm278_vm3 = vc.u32 %v276_v19, %v272_v47  ;;  %v229_v25 = vsel %vm225_vm11, %v785_v14, %v228_v5  ;;  %v251_v63 = vshrl.u32 %v246_v41, 16 }
  0xcd   :  { %v478_v50 = vmul.f32 %v477_v28, %v473_v0  ;;  %v485_v52 = vmul.f32 %v484_v17, %v473_v0  ;;  %v158_v53 = vmul.f32 %v157_v54, %v155_v49  ;;  %v279_v46 = vsel %vm278_vm3, 1, %v568_v2 }
  0xce   :  { %v271_v1 = vshrl.u32 %v267_v3, 16  ;;  %v281_v51 = vadd.s32 %v279_v46, %v277_v61  ;;  %vm490_vm4 = vcmp.lt.s32.totalorder %v822_v44, 2  ;;  %vm860_vm5 = vcmp.le.f32.partialorder %v37_v11, 0.7853982 }
  0xcf   :  { %v479_v56 = vadd.f32 1.0, %v478_v50  ;;  %v486_v60 = vadd.f32 1.0, %v485_v52  ;;  %v159_v6 = vxor.u32 2147483648, %v158_v53  ;;  %v261_v12 = vadd.s32 %v260_v55, %v251_v63 }
  0xd0   :  { %vm491_vm6 = vcmp.eq.s32.totalorder %v822_v44, 0  ;;  %v273_v5 = vshrl.u32 %v845_v26, 16  ;;  %v282_v2 = vadd.s32 %v281_v51, %v271_v1  ;;  %vm494_vm7 = vcmp.eq.s32.totalorder %v822_v44, 2 }
  0xd1   :  { %v487_v0 = vmul.f32 %v486_v60, %v471_v62  ;;  %v495_v15 = vxor.u32 2147483648, %v479_v56  ;;  %v160_v62 = vsel %vm39_vm1, %v159_v6, %v158_v53  ;;  %v230_v11 = vsel %vm224_vm13, %v840_v31, %v229_v25 }
  0xd2   :  { %v280_v41 = vadd.s32 %v276_v19, %v272_v47  ;;  %v163_v59 = vsel %vm860_vm5, %v609_v8, %v160_v62  ;;  %v283_v29 = vadd.s32 %v282_v2, %v273_v5  ;;  %vm488_vm8 = vweird.f32 %v607_v7 }
  0xd3   :  { %v492_v14 = vxor.u32 2147483648, %v487_v0  ;;  %v496_v45 = vsel %vm494_vm7, %v495_v15, %v487_v0  ;;  %v165_v33 = vmul.f32 %v163_v59, %v163_v59  ;;  %v284_v24 = vmul.u32 %v805_v39, %v230_v11 }
  0xd4   :  { %vm286_vm9 = vc.u32 %v261_v12, %v280_v41  ;;  %v287_v21 = vadd.s32 1, %v283_v29  ;;  %v161_v27 = vsub.s32 4, %v783_v13  ;;  %vm180_vm14 = vweird.f32 %v609_v8 }
  0xd5   :  { %v493_v3 = vsel %vm491_vm6, %v479_v56, %v492_v14  ;;  %v166_v58 = vmul.f32 -0.001358992, %v165_v33  ;;  %v173_v31 = vmul.f32 -0.00019511016, %v165_v33  ;;  %v285_v61 = vadd.s32 %v280_v41, %v261_v12 }
  0xd6   :  { %v497_v26 = vsel %vm490_vm4, %v493_v3, %v496_v45  ;;  %v288_v37 = vsel %vm286_vm9, %v287_v21, %v283_v29  ;;  %v162_v44 = vsel %vm39_vm1, %v161_v27, %v783_v13  ;;  %vm193_vm0 = vcmp.lt.s32.totalorder %v632_v42, 0 }
  0xd7   :  { %v498_v16 = vsel %vm488_vm8, nan, %v497_v26  ;;  %v167_v48 = vadd.f32 0.041655596, %v166_v58  ;;  %v174_v22 = vadd.f32 0.008332121, %v173_v31  ;;  %v289_v30 = vadd.s32 %v288_v37, %v284_v24 }
  0xd8   :  { %501 = vst [vmem:[#allocation2 + $0x10] sm:$0xf] %v498_v16  ;;  %v164_v38 = vsel %vm860_vm5, 0, %v162_v44  ;;  %vm889_vm1 = vcmp.le.f32.partialorder %v191_v10, 0.7853982  ;;  %vm334_vm5 = vweird.f32 %v632_v42 }
  0xd9   :  { %v168_v32 = vmul.f32 %v167_v48, %v165_v33  ;;  %v175_v7 = vmul.f32 %v174_v22, %v165_v33  ;;  %v290_v34 = vadd.s32 536870912, %v289_v30  ;;  %v181_v40 = vand.u32 3, %v164_v38 }
  0xdb   :  { %v169_v9 = vadd.f32 -0.4999988, %v168_v32  ;;  %v176_v36 = vadd.f32 -0.16666654, %v175_v7  ;;  %v291_v20 = vshrl.u32 %v290_v34, 30  ;;  %vm183_vm11 = vcmp.eq.s32.totalorder %v181_v40, 0 }
  0xdc   :  { %vm186_vm12 = vcmp.eq.s32.totalorder %v181_v40, 2  ;;  %vm182_vm13 = vcmp.lt.s32.totalorder %v181_v40, 2 }
  0xdd   :  { %v170_v39 = vmul.f32 %v169_v9, %v165_v33  ;;  %v177_v28 = vmul.f32 %v176_v36, %v165_v33  ;;  %v292_v17 = vshll.u32 %v291_v20, 30  ;;  %v315_v3 = vsub.s32 4, %v291_v20 }
  0xdf   :  { %v171_v35 = vadd.f32 1.0, %v170_v39  ;;  %v178_v23 = vadd.f32 1.0, %v177_v28  ;;  %v293_v18 = vsub.s32 %v289_v30, %v292_v17  ;;  %v316_v33 = vsel %vm193_vm0, %v315_v3, %v291_v20 }
  0xe0   :  { %v318_v10 = vsel %vm889_vm1, 0, %v316_v33 }
  0xe1   :  { %v179_v43 = vmul.f32 %v178_v23, %v163_v59  ;;  %v187_v47 = vxor.u32 2147483648, %v171_v35  ;;  %vm294_vm10 = vcmp.lt.s32.totalorder %v293_v18, 0  ;;  %v295_v50 = vsub.s32 0, %v293_v18 }
  0xe2   :  { %v335_v37 = vand.u32 3, %v318_v10 }
  0xe3   :  { %v184_v52 = vxor.u32 2147483648, %v179_v43  ;;  %v296_v19 = vsel %vm294_vm10, %v295_v50, %v293_v18  ;;  %v188_v54 = vsel %vm186_vm12, %v187_v47, %v179_v43 }
  0xe4   :  { %v297_v13 = vclz %v296_v19  ;;  %vm337_vm2 = vcmp.eq.s32.totalorder %v335_v37, 0  ;;  %vm340_vm3 = vcmp.eq.s32.totalorder %v335_v37, 2  ;;  %vm336_vm4 = vcmp.lt.s32.totalorder %v335_v37, 2 }
  0xe5   :  { %v185_v49 = vsel %vm183_vm11, %v171_v35, %v184_v52 }
  0xe6   :  { %v189_v55 = vsel %vm182_vm13, %v185_v49, %v188_v54  ;;  %v524_v57 = vadd.s32 4294967294, %v297_v13 }
  0xe7   :  { %v190_v56 = vsel %vm180_vm14, nan, %v189_v55 }
  0xe8   :  { %499 = vst [vmem:[#allocation2] sm:$0xff] %v190_v56  ;;  %vm525_vm15 = vcmp.lt.s32.totalorder %v524_v57, 0 }
  0xe9   :  { %v300_v60 = vsel %vm525_vm15, 0, %v524_v57 }
  0xea   :  { %v301_v53 = vsub.s32 32, %v300_v60  ;;  %v305_v25 = vsub.s32 4294967266, %v300_v60  ;;  %v302_v63 = vshll.u32 %v293_v18, %v300_v60 }
  0xec   :  { %v303_v46 = vshrl.u32 %v285_v61, %v301_v53  ;;  %v306_v0 = vadd.s32 127, %v305_v25 }
  0xee   :  { %v304_v15 = vor.u32 %v303_v46, %v302_v63  ;;  %v307_v1 = vshll.u32 %v306_v0, 23 }
  0xf0   :  { %v308_v51 = vor.u32 4788187, %v307_v1  ;;  %v311_v6 = vcvt.s32.f32 %v304_v15 }
  0xf2   :  { %v309_v4 = vand.u32 2147483647, %v308_v51 }
  0xf4   :  { %v312_v14 = vmul.f32 %v311_v6, %v309_v4 }
  0xf6   :  { %v313_v5 = vxor.u32 2147483648, %v312_v14 }
  0xf8   :  { %v314_v12 = vsel %vm193_vm0, %v313_v5, %v312_v14 }
  0xf9   :  { %v317_v2 = vsel %vm889_vm1, %v632_v42, %v314_v12 }
  0xfa   :  { %v319_v62 = vmul.f32 %v317_v2, %v317_v2 }
  0xfc   :  { %v320_v11 = vmul.f32 -0.001358992, %v319_v62  ;;  %v327_v41 = vmul.f32 -0.00019511016, %v319_v62 }
  0xfe   :  { %v321_v45 = vadd.f32 0.041655596, %v320_v11  ;;  %v328_v59 = vadd.f32 0.008332121, %v327_v41 }
 0x100   :  { %v322_v29 = vmul.f32 %v321_v45, %v319_v62  ;;  %v329_v26 = vmul.f32 %v328_v59, %v319_v62 }
 0x102   :  { %v323_v16 = vadd.f32 -0.4999988, %v322_v29  ;;  %v330_v21 = vadd.f32 -0.16666654, %v329_v26 }
 0x104   :  { %v324_v58 = vmul.f32 %v323_v16, %v319_v62  ;;  %v331_v31 = vmul.f32 %v330_v21, %v319_v62 }
 0x106   :  { %v325_v24 = vadd.f32 1.0, %v324_v58  ;;  %v332_v27 = vadd.f32 1.0, %v331_v31 }
 0x108   :  { %v333_v48 = vmul.f32 %v332_v27, %v317_v2  ;;  %v341_v22 = vxor.u32 2147483648, %v325_v24 }
 0x10a   :  { %v338_v30 = vxor.u32 2147483648, %v333_v48  ;;  %v342_v7 = vsel %vm340_vm3, %v341_v22, %v333_v48 }
 0x10c   :  { %v339_v32 = vsel %vm337_vm2, %v325_v24, %v338_v30 }
 0x10d   :  { %v343_v34 = vsel %vm336_vm4, %v339_v32, %v342_v7 }
 0x10e   :  { %v344_v44 = vsel %vm334_vm5, nan, %v343_v34 }
 0x10f   :  { %500 = vst [vmem:[#allocation2 + $0x8] sm:$0xff] %v344_v44 }
 0x110   :  { %514 = dma.vmem_to_hbm [thread:$0]  %s507_s1, 384, %s509_s19, [#allocation3], %s576_s20, %s576_s20, %s577_s21  }
 0x111   :  { %566 = dma.done.wait [#allocation3], 384  }
 0x112   :  { %567 = vsyncadd [#allocation3], 4294966912 }
 0x113   :  { %519 = vsyncpa [#allocation3], 1 }

</bundles_post_ra>
